<compile_context>
chip_gen: v5e
topology: v5e:2x2
jax: 0.10.0
libtpu: 0.0.40
codegen_flags: <defaults>
</compile_context>

<pallas_src>
import jax
import jax.numpy as jnp
from jax.experimental import pallas as pl
from jax.experimental.pallas import tpu as pltpu

H1, H2, H3 = 512, 128, 64
_LANE = 128


def _round_up(v, m):
    return ((v + m - 1) // m) * m


def _cdiv(a, b):
    return -(-a // b)


def _mlp_kernel(x_ref,
                w1_ref, t1_ref,
                w2_ref, t2_ref,
                w3_ref, t3_ref,
                wo_ref, bo_ref,
                o_ref):
    """Fused 4-layer MLP.  BN scale is folded into the weights; t*_ref is the
    per-feature shift (bias + BN folded), kept in f32.  Matmuls run in the
    weight dtype (bf16 or f32) with f32 accumulation."""
    cdt = w1_ref.dtype  # matmul compute dtype

    # layer_1 + batchnorm1 + relu
    h = jnp.dot(x_ref[...], w1_ref[...], preferred_element_type=jnp.float32)
    h = jnp.maximum(h + t1_ref[...], 0.0)

    # layer_2 + batchnorm2 + relu   (dropout: identity in eval)
    h = jnp.dot(h.astype(cdt), w2_ref[...], preferred_element_type=jnp.float32)
    h = jnp.maximum(h + t2_ref[...], 0.0)

    # layer_3 + batchnorm3 + relu   (dropout: identity in eval)
    h = jnp.dot(h.astype(cdt), w3_ref[...], preferred_element_type=jnp.float32)
    h = jnp.maximum(h + t3_ref[...], 0.0)

    # layer_out (narrow C output; masked store is negligible at small C)
    out = jnp.dot(h.astype(cdt), wo_ref[...], preferred_element_type=jnp.float32)
    o_ref[...] = (out + bo_ref[...]).astype(o_ref.dtype)


def _choose_batch_tile(B, block_b, sub):
    """Pick the batch tile: big (amortize per-step overhead, fill MXU M-dim),
    multiple of the sublane granule, and yielding >=2 (preferably even) grid
    steps so both v7x TensorCores get work."""
    tb = _round_up(min(block_b, _round_up(B, sub)), sub)
    if B >= 2 * sub:
        tb = min(tb, _round_up(_cdiv(B, 2), sub))  # keep at least 2 tiles
    n = _cdiv(B, tb)
    if n > 1 and n % 2 == 1:                       # prefer an even tile count
        tb_alt = _round_up(_cdiv(B, n + 1), sub)
        if tb_alt >= sub:
            tb = tb_alt
    return tb


def multiclass_classification_forward(x, params, *, block_b=1024, use_bf16=True):
    """x: (B, F) float32.  params: dict produced by init_params()."""
    B, F = x.shape
    C = params["wo"].shape[1]
    eps = 1e-5
    compute_dtype = jnp.bfloat16 if use_bf16 else jnp.float32
    itemsize = jnp.dtype(compute_dtype).itemsize

    # --- One-time parameter transform: fold eval-mode BN into weight/shift ---
    # y = gamma * (xW + b - mean) / sqrt(var+eps) + beta
    #   = x @ (W * scale) + shift,  scale = gamma/sqrt(var+eps),
    #                               shift = (b - mean)*scale + beta
    def fold(w, bias, gamma, beta, mean, var):
        scale = gamma / jnp.sqrt(var + eps)
        shift = (bias - mean) * scale + beta
        return (w * scale[None, :]).astype(compute_dtype), \
               shift.reshape(1, -1).astype(jnp.float32)

    w1, t1 = fold(params["w1"], params["b1"], params["g1"], params["be1"],
                  params["m1"], params["v1"])
    w2, t2 = fold(params["w2"], params["b2"], params["g2"], params["be2"],
                  params["m2"], params["v2"])
    w3, t3 = fold(params["w3"], params["b3"], params["g3"], params["be3"],
                  params["m3"], params["v3"])

    # --- Lane-dim padding for dense layouts / full MXU fill ---
    F_pad = _round_up(F, _LANE)                    # x columns / w1 rows
    if F_pad != F:
        w1 = jnp.pad(w1, ((0, F_pad - F), (0, 0)))

    H3P = _round_up(H3, _LANE)                     # 64 -> 128
    if H3P != H3:
        w3 = jnp.pad(w3, ((0, 0), (0, H3P - H3)))
        t3 = jnp.pad(t3, ((0, 0), (0, H3P - H3)))  # pad shift with 0: relu(0)=0
        wo_raw = jnp.pad(params["wo"], ((0, H3P - H3), (0, 0)))
    else:
        wo_raw = params["wo"]
    wo = wo_raw.astype(compute_dtype)
    bo = params["bo"].astype(jnp.float32).reshape(1, C)

    # --- Batch tiling ---
    sub = 16 if use_bf16 else 8   # sublane packing granule for the x-tile dtype
    tb = _choose_batch_tile(B, block_b, sub)
    B_pad = _round_up(B, tb)
    xk = x.astype(compute_dtype)
    if F_pad != F:
        xk = jnp.pad(xk, ((0, 0), (0, F_pad - F)))
    if B_pad != B:
        xk = jnp.pad(xk, ((0, B_pad - B), (0, 0)))
    grid = (B_pad // tb,)

    def resident(shape):
        return pl.BlockSpec(shape, lambda i, _n=len(shape): (0,) * _n)

    args = (xk, w1, t1, w2, t2, w3, t3, wo, bo)
    in_specs = [pl.BlockSpec((tb, F_pad), lambda i: (i, 0))] \
             + [resident(a.shape) for a in args[1:]]
    out_specs = pl.BlockSpec((tb, C), lambda i: (i, 0))

    # --- VMEM budget: every input (incl. resident weights) is double-buffered,
    #     plus streamed x/out tiles and f32/bf16 intermediates.  Cap at ~75% of
    #     physical per-core VMEM (48 MiB on v7x, 96 MiB on v5e/v6e). ---
    weight_bytes = (F_pad * H1 + H1 * H2 + H2 * H3P + H3P * C) * itemsize \
                 + (H1 + H2 + H3P + C) * 4
    tile_bytes = 2 * (tb * F_pad * itemsize) + 2 * (tb * C * 4)
    interm_bytes = tb * (H1 + H2 + H3P) * (4 + itemsize)
    need = 2 * weight_bytes + tile_bytes + interm_bytes
    try:
        vmem_cap = int(pltpu.get_tpu_info().vmem_capacity_bytes)
    except Exception:
        vmem_cap = 64 * 1024 * 1024   # conservative (v7x per-core)
    budget = int(0.75 * vmem_cap)
    vmem_limit = min(budget, max(32 * 1024 * 1024, 2 * need))

    flops = 2 * B_pad * (F_pad * H1 + H1 * H2 + H2 * H3P + H3P * C)
    bytes_accessed = xk.size * itemsize + weight_bytes + B_pad * C * 4

    out = pl.pallas_call(
        _mlp_kernel,
        out_shape=jax.ShapeDtypeStruct((B_pad, C), jnp.float32),
        grid=grid,
        in_specs=in_specs,
        out_specs=out_specs,
        compiler_params=pltpu.CompilerParams(
            dimension_semantics=("parallel",),
            vmem_limit_bytes=vmem_limit),
        cost_estimate=pl.CostEstimate(
            flops=flops, transcendentals=0, bytes_accessed=bytes_accessed),
    )(*args)

    return out[:B]


def init_params(key, num_feature, num_class):
    """Deterministic synthetic parameters matching the PyTorch module shapes."""
    dims = [(num_feature, H1), (H1, H2), (H2, H3), (H3, num_class)]
    keys = jax.random.split(key, 32)
    ki = iter(keys)

    def linear(kw, kb, fan_in, fan_out):
        bound = 1.0 / jnp.sqrt(jnp.float32(fan_in))
        w = jax.random.uniform(kw, (fan_in, fan_out), jnp.float32, -bound, bound)
        b = jax.random.uniform(kb, (fan_out,), jnp.float32, -bound, bound)
        return w, b

    p = {}
    p["w1"], p["b1"] = linear(next(ki), next(ki), *dims[0])
    p["w2"], p["b2"] = linear(next(ki), next(ki), *dims[1])
    p["w3"], p["b3"] = linear(next(ki), next(ki), *dims[2])
    p["wo"], p["bo"] = linear(next(ki), next(ki), *dims[3])

    for i, d in zip((1, 2, 3), (H1, H2, H3)):
        p[f"g{i}"] = 1.0 + 0.1 * jax.random.normal(next(ki), (d,), jnp.float32)
        p[f"be{i}"] = 0.1 * jax.random.normal(next(ki), (d,), jnp.float32)
        p[f"m{i}"] = 0.05 * jax.random.normal(next(ki), (d,), jnp.float32)
        p[f"v{i}"] = 1.0 + 0.1 * jax.random.uniform(next(ki), (d,), jnp.float32)
    return p


def _reference_forward(x, params):
    """Plain-JAX reference (eval-mode PyTorch semantics) for validation."""
    eps = 1e-5

    def bn(z, g, b, m, v):
        return g * (z - m) / jnp.sqrt(v + eps) + b

    h = x @ params["w1"] + params["b1"]
    h = jax.nn.relu(bn(h, params["g1"], params["be1"], params["m1"], params["v1"]))
    h = h @ params["w2"] + params["b2"]
    h = jax.nn.relu(bn(h, params["g2"], params["be2"], params["m2"], params["v2"]))
    h = h @ params["w3"] + params["b3"]
    h = jax.nn.relu(bn(h, params["g3"], params["be3"], params["m3"], params["v3"]))
    return h @ params["wo"] + params["bo"]


if __name__ == "__main__":
    num_feature = 32
    num_class = 8
    batch = 16

    key = jax.random.PRNGKey(0)
    kx, kp, kx2 = jax.random.split(key, 3)
    x = jax.random.normal(kx, (batch, num_feature), jnp.float32)
    params = init_params(kp, num_feature, num_class)

    ref = _reference_forward(x, params)

    # Exact-semantics check: f32 matmul path must match the reference tightly.
    out_f32 = jax.block_until_ready(
        multiclass_classification_forward(x, params, use_bf16=False))
    assert out_f32.shape == (batch, num_class)
    assert jnp.allclose(out_f32, ref, atol=1e-4, rtol=1e-4), \
        "f32 kernel mismatch vs JAX reference"

    # Fast path: bf16 matmul inputs, f32 accumulation (default on v6e/v7x).
    out_bf16 = jax.block_until_ready(
        multiclass_classification_forward(x, params, use_bf16=True))
    assert out_bf16.shape == (batch, num_class)
    assert jnp.allclose(out_bf16, ref, atol=1e-1, rtol=1e-1), \
        "bf16 kernel mismatch vs JAX reference"

    # Multi-tile path (grid >= 2, exercises the batch-tile selection + padding).
    x_big = jax.random.normal(kx2, (96, num_feature), jnp.float32)
    ref_big = _reference_forward(x_big, params)
    out_big = jax.block_until_ready(
        multiclass_classification_forward(x_big, params, use_bf16=False))
    assert out_big.shape == (96, num_class)
    assert jnp.allclose(out_big, ref_big, atol=1e-4, rtol=1e-4), \
        "multi-tile f32 kernel mismatch vs JAX reference"

    print("KERNEL_OK")
</pallas_src>

<mosaic_0001>
module attributes {stable_mosaic.version = 11 : i64} {
  func.func @_mlp_kernel(%arg0: i32, %arg1: memref<8x128xf32, #tpu.memory_space<vmem>>, %arg2: memref<128x512xf32, #tpu.memory_space<vmem>>, %arg3: memref<1x512xf32, #tpu.memory_space<vmem>>, %arg4: memref<512x128xf32, #tpu.memory_space<vmem>>, %arg5: memref<1x128xf32, #tpu.memory_space<vmem>>, %arg6: memref<128x128xf32, #tpu.memory_space<vmem>>, %arg7: memref<1x128xf32, #tpu.memory_space<vmem>>, %arg8: memref<128x8xf32, #tpu.memory_space<vmem>>, %arg9: memref<1x8xf32, #tpu.memory_space<vmem>>, %arg10: memref<8x8xf32, #tpu.memory_space<vmem>>) attributes {dimension_semantics = [#tpu.dimension_semantics<parallel>], iteration_bounds = array<i64: 2>, scalar_prefetch = 0 : i64, scratch_operands = 0 : i64, tpu.core_type = #tpu.core_type<tc>, window_params = [{transform_indices = @transform_0, window_bounds = array<i64: 8, 128>}, {pipeline_mode = #tpu.pipeline_mode<synchronous>, transform_indices = @transform_1, window_bounds = array<i64: 128, 512>}, {pipeline_mode = #tpu.pipeline_mode<synchronous>, transform_indices = @transform_2, window_bounds = array<i64: 1, 512>}, {pipeline_mode = #tpu.pipeline_mode<synchronous>, transform_indices = @transform_3, window_bounds = array<i64: 512, 128>}, {pipeline_mode = #tpu.pipeline_mode<synchronous>, transform_indices = @transform_4, window_bounds = array<i64: 1, 128>}, {pipeline_mode = #tpu.pipeline_mode<synchronous>, transform_indices = @transform_5, window_bounds = array<i64: 128, 128>}, {pipeline_mode = #tpu.pipeline_mode<synchronous>, transform_indices = @transform_6, window_bounds = array<i64: 1, 128>}, {pipeline_mode = #tpu.pipeline_mode<synchronous>, transform_indices = @transform_7, window_bounds = array<i64: 128, 8>}, {pipeline_mode = #tpu.pipeline_mode<synchronous>, transform_indices = @transform_8, window_bounds = array<i64: 1, 8>}, {transform_indices = @transform_9, window_bounds = array<i64: 8, 8>}]} {
    %c0 = arith.constant 0 : index
    %c0_0 = arith.constant 0 : index
    %0 = vector.load %arg1[%c0, %c0_0] : memref<8x128xf32, #tpu.memory_space<vmem>>, vector<8x128xf32>
    %c0_1 = arith.constant 0 : index
    %c0_2 = arith.constant 0 : index
    %1 = vector.load %arg2[%c0_1, %c0_2] : memref<128x512xf32, #tpu.memory_space<vmem>>, vector<128x512xf32>
    %cst = arith.constant dense<0.000000e+00> : vector<8x512xf32>
    %2 = tpu.matmul %0, %1, %cst {dimension_numbers = #tpu.dot_dimension_numbers<[1], [0], [0], [1], [0, 0, 1, 1], [], []>} : vector<8x128xf32>, vector<128x512xf32>, vector<8x512xf32> -> vector<8x512xf32>
    %c0_3 = arith.constant 0 : index
    %c0_4 = arith.constant 0 : index
    %3 = vector.load %arg3[%c0_3, %c0_4] : memref<1x512xf32, #tpu.memory_space<vmem>>, vector<1x512xf32>
    %4 = vector.broadcast %3 : vector<1x512xf32> to vector<8x512xf32>
    %5 = arith.addf %2, %4 : vector<8x512xf32>
    %cst_5 = arith.constant 0.000000e+00 : f32
    %6 = vector.broadcast %cst_5 : f32 to vector<8x512xf32>
    %7 = arith.maximumf %5, %6 : vector<8x512xf32>
    %c0_6 = arith.constant 0 : index
    %c0_7 = arith.constant 0 : index
    %8 = vector.load %arg4[%c0_6, %c0_7] : memref<512x128xf32, #tpu.memory_space<vmem>>, vector<512x128xf32>
    %cst_8 = arith.constant dense<0.000000e+00> : vector<8x128xf32>
    %9 = tpu.matmul %7, %8, %cst_8 {dimension_numbers = #tpu.dot_dimension_numbers<[1], [0], [0], [1], [0, 0, 1, 1], [], []>} : vector<8x512xf32>, vector<512x128xf32>, vector<8x128xf32> -> vector<8x128xf32>
    %c0_9 = arith.constant 0 : index
    %c0_10 = arith.constant 0 : index
    %10 = vector.load %arg5[%c0_9, %c0_10] : memref<1x128xf32, #tpu.memory_space<vmem>>, vector<1x128xf32>
    %11 = vector.broadcast %10 : vector<1x128xf32> to vector<8x128xf32>
    %12 = arith.addf %9, %11 : vector<8x128xf32>
    %cst_11 = arith.constant 0.000000e+00 : f32
    %13 = vector.broadcast %cst_11 : f32 to vector<8x128xf32>
    %14 = arith.maximumf %12, %13 : vector<8x128xf32>
    %c0_12 = arith.constant 0 : index
    %c0_13 = arith.constant 0 : index
    %15 = vector.load %arg6[%c0_12, %c0_13] : memref<128x128xf32, #tpu.memory_space<vmem>>, vector<128x128xf32>
    %cst_14 = arith.constant dense<0.000000e+00> : vector<8x128xf32>
    %16 = tpu.matmul %14, %15, %cst_14 {dimension_numbers = #tpu.dot_dimension_numbers<[1], [0], [0], [1], [0, 0, 1, 1], [], []>} : vector<8x128xf32>, vector<128x128xf32>, vector<8x128xf32> -> vector<8x128xf32>
    %c0_15 = arith.constant 0 : index
    %c0_16 = arith.constant 0 : index
    %17 = vector.load %arg7[%c0_15, %c0_16] : memref<1x128xf32, #tpu.memory_space<vmem>>, vector<1x128xf32>
    %18 = vector.broadcast %17 : vector<1x128xf32> to vector<8x128xf32>
    %19 = arith.addf %16, %18 : vector<8x128xf32>
    %cst_17 = arith.constant 0.000000e+00 : f32
    %20 = vector.broadcast %cst_17 : f32 to vector<8x128xf32>
    %21 = arith.maximumf %19, %20 : vector<8x128xf32>
    %c0_18 = arith.constant 0 : index
    %c0_19 = arith.constant 0 : index
    %22 = vector.load %arg8[%c0_18, %c0_19] : memref<128x8xf32, #tpu.memory_space<vmem>>, vector<128x8xf32>
    %cst_20 = arith.constant dense<0.000000e+00> : vector<8x8xf32>
    %23 = tpu.matmul %21, %22, %cst_20 {dimension_numbers = #tpu.dot_dimension_numbers<[1], [0], [0], [1], [0, 0, 1, 1], [], []>} : vector<8x128xf32>, vector<128x8xf32>, vector<8x8xf32> -> vector<8x8xf32>
    %c0_21 = arith.constant 0 : index
    %c0_22 = arith.constant 0 : index
    %24 = vector.load %arg9[%c0_21, %c0_22] : memref<1x8xf32, #tpu.memory_space<vmem>>, vector<1x8xf32>
    %25 = vector.broadcast %24 : vector<1x8xf32> to vector<8x8xf32>
    %26 = arith.addf %23, %25 : vector<8x8xf32>
    %c0_23 = arith.constant 0 : index
    %c0_24 = arith.constant 0 : index
    %27 = vector.load %arg10[%c0_23, %c0_24] : memref<8x8xf32, #tpu.memory_space<vmem>>, vector<8x8xf32>
    tpu.vector_store %arg10[%c0_23, %c0_24], %26 {strides = array<i32>} : memref<8x8xf32, #tpu.memory_space<vmem>>, vector<8x8xf32>,
    return
  }
  func.func @transform_0(%arg0: i32) -> (i32, i32) {
    %c0_i32 = arith.constant 0 : i32
    %c0_i32_0 = arith.constant 0 : i32
    return %arg0, %c0_i32 : i32, i32
  }
  func.func @transform_1(%arg0: i32) -> (i32, i32) {
    %c0_i32 = arith.constant 0 : i32
    %c0_i32_0 = arith.constant 0 : i32
    %c0_i32_1 = arith.constant 0 : i32
    return %c0_i32, %c0_i32_0 : i32, i32
  }
  func.func @transform_2(%arg0: i32) -> (i32, i32) {
    %c0_i32 = arith.constant 0 : i32
    %c0_i32_0 = arith.constant 0 : i32
    %c0_i32_1 = arith.constant 0 : i32
    return %c0_i32, %c0_i32_0 : i32, i32
  }
  func.func @transform_3(%arg0: i32) -> (i32, i32) {
    %c0_i32 = arith.constant 0 : i32
    %c0_i32_0 = arith.constant 0 : i32
    %c0_i32_1 = arith.constant 0 : i32
    return %c0_i32, %c0_i32_0 : i32, i32
  }
  func.func @transform_4(%arg0: i32) -> (i32, i32) {
    %c0_i32 = arith.constant 0 : i32
    %c0_i32_0 = arith.constant 0 : i32
    %c0_i32_1 = arith.constant 0 : i32
    return %c0_i32, %c0_i32_0 : i32, i32
  }
  func.func @transform_5(%arg0: i32) -> (i32, i32) {
    %c0_i32 = arith.constant 0 : i32
    %c0_i32_0 = arith.constant 0 : i32
    %c0_i32_1 = arith.constant 0 : i32
    return %c0_i32, %c0_i32_0 : i32, i32
  }
  func.func @transform_6(%arg0: i32) -> (i32, i32) {
    %c0_i32 = arith.constant 0 : i32
    %c0_i32_0 = arith.constant 0 : i32
    %c0_i32_1 = arith.constant 0 : i32
    return %c0_i32, %c0_i32_0 : i32, i32
  }
  func.func @transform_7(%arg0: i32) -> (i32, i32) {
    %c0_i32 = arith.constant 0 : i32
    %c0_i32_0 = arith.constant 0 : i32
    %c0_i32_1 = arith.constant 0 : i32
    return %c0_i32, %c0_i32_0 : i32, i32
  }
  func.func @transform_8(%arg0: i32) -> (i32, i32) {
    %c0_i32 = arith.constant 0 : i32
    %c0_i32_0 = arith.constant 0 : i32
    %c0_i32_1 = arith.constant 0 : i32
    return %c0_i32, %c0_i32_0 : i32, i32
  }
  func.func @transform_9(%arg0: i32) -> (i32, i32) {
    %c0_i32 = arith.constant 0 : i32
    %c0_i32_0 = arith.constant 0 : i32
    return %arg0, %c0_i32 : i32, i32
  }
}

</mosaic_0001>

<bundles_post_ra>
// kernel: tpu_custom_call.1
= control target key start
LH: loop header
LB: loop body
LE: loop exit
PB: predicated region body
PF: predicated region fallthrough
CT: control target
= control target key end

     0   :  { %14 = vsyncpa [#allocation3], 0  ;;  %s1347_s0 = inlined_call_operand.hbm [shape: f32[16,128], index: 0, kind: input, shape index: {}]   ;;  %s1348_s1 = inlined_call_operand.hbm [shape: f32[128,512], index: 1, kind: input, shape index: {}]   ;;  %s1349_s2 = inlined_call_operand.vmem [shape: f32[1,512], index: 2, kind: input, shape index: {}]   ;;  %s1350_s3 = inlined_call_operand.hbm [shape: f32[512,128], index: 3, kind: input, shape index: {}]   ;;  %s1351_s4 = inlined_call_operand.vmem [shape: f32[1,128], index: 4, kind: input, shape index: {}]   ;;  %s1352_s5 = inlined_call_operand.vmem [shape: f32[128,128], index: 5, kind: input, shape index: {}]   ;;  %s1353_s6 = inlined_call_operand.vmem [shape: f32[1,128], index: 6, kind: input, shape index: {}]   ;;  %s1354_s7 = inlined_call_operand.vmem [shape: f32[128,8], index: 7, kind: input, shape index: {}]   ;;  %s1355_s8 = inlined_call_operand.vmem [shape: f32[1,8], index: 8, kind: input, shape index: {}]   ;;  %s1356_s9 = inlined_call_operand.vmem [shape: f32[16,8], index: 9, kind: output, shape index: {}]  }
   0x1   :  { %16 = vsyncpa [#allocation3 + $0x1], 0 }
   0x2   :  { %17 = vsyncpa [#allocation5], 0  ;;  %s1125_s30 = smov 0   ;;  %s1127_s10 = smov 0  }
   0x3   :  { %s1129_s11 = smov 0   ;;  %s1131_s12 = smov 0  }
   0x4 LB: > { %s259_s15 = sshll.u32 %s1348_s1, 4  ;;  %s1149_s16 = sadd.s32 4294967295, %s1067_s12   ;;  %s1067_s12 = sphi %s1131_s12, %s1363_s12   ;;  %s1063_s11 = sphi %s1129_s11, %s1362_s11   ;;  %s1059_s10 = sphi %s1127_s10, %s1361_s10   ;;  %s1055_s30 = sphi %s1125_s30, %s1360_s30   ;;  %s260_s15 = int_to_ptr.hbm [resolvable:$true] %s259_s15 }
   0x5   : > { %p859_p0 = scmp.ge.s32.totalorder %s1067_s12, 1  ;;  %p44_p1 = scmp.eq.s32.totalorder %s1149_s16, 0 }
   0x6   : > { %p248_p2 = scmp.lt.s32.totalorder %s1067_s12, 3  ;;  %s1069_s18 = smov [#allocation4]  }
   0x7   : > { %s261_s19 = sshll.u32 %s1069_s18, 4  ;;  %s276_s22 = sshll.u32 %s1350_s3, 4  ;;  %s262_s19 = int_to_ptr.vmem [resolvable:$true] %s261_s19  ;;  %s277_s22 = int_to_ptr.hbm [resolvable:$true] %s276_s22 }
   0x8   : > { %p1154_p3 = pnand %p859_p0, %p248_p2  ;;  %s1070_s23 = smov [#allocation6]  }
   0x9   : > { %s278_s24 = sshll.u32 %s1070_s23, 4  ;;  %s1071_s25 = smov 512   ;;  %s279_s24 = int_to_ptr.vmem [resolvable:$true] %s278_s24 }
   0xa   : > { %p882_p4 = pneg %p1154_p3  ;;  %s1072_s26 = smov 32  }
   0xb   : > { %s1073_s27 = smov 128   ;;  %s1074_s28 = smov 8  }
   0xc   : > { %p883_p5 = pnand %p882_p4, %p44_p1  ;;  %s1166_s29 = sadd.s32 1, %s1067_s12  }
   0xd   : > { %s27_s13 = ssub.s32 %s1067_s12, %s1166_s29  ;;  %s30_s14 = sadd.s32 1, %s1063_s11 }
   0xe   : > { %885 = dma.hbm_to_vmem [thread:$0]  (!%p883_p5), %s260_s15, 8192, %s262_s19, [#allocation5], %s1071_s25, %s1071_s25, %s1072_s26  }
   0xf   : > { %888 = dma.hbm_to_vmem [thread:$0]  (!%p883_p5), %s277_s22, 8192, %s279_s24, [#allocation5], %s1073_s27, %s1073_s27, %s1074_s28  }
  0x10   : > { %p28_p6 = scmp.eq.s32.totalorder %s27_s13, 0  ;;  %p37_p7 = scmp.ne.s32.totalorder %s1063_s11, %s1059_s10 }
  0x11   : > { %p38_p8 = scmp.eq.s32.totalorder %s1067_s12, 0  ;;  %p43_p9 = scmp.ne.s32.totalorder %s1059_s10, %s1055_s30 }
  0x12   : > { %s1177_s18 = scalar_select %p28_p6, %s1063_s11, %s30_s14  }
  0x13   : > { %p1181_p10 = por %p44_p1, %p43_p9  ;;  %p895_p11 = scmp.lt.s32.totalorder %s1067_s12, 2 }
  0x14   : > { %s307_s15 = sand.u32 1, %s1063_s11   ;;  %s864_s19 = sshll.u32 %s1067_s12, 3 }
  0x15   : > { %p39_p12 = por %p38_p8, %p37_p7  ;;  %s863_s21 = sshll.u32 %s307_s15, 3 }
  0x16   : > { %s315_s24 = scalar_lea.hbm %s1347_s0, %s864_s19  ;;  %s311_s26 = scalar_lea.vmem [#allocation2], %s863_s21 }
  0x17   : > { %s317_s25 = sshll.u32 %s315_s24, 4  ;;  %s319_s27 = sshll.u32 %s311_s26, 4  ;;  %s318_s25 = int_to_ptr.hbm [resolvable:$true] %s317_s25  ;;  %s320_s27 = int_to_ptr.vmem [resolvable:$true] %s319_s27 }
  0x18   : > { %p1191_p13 = pnand %p895_p11, %p39_p12  ;;  %s308_s28 = scalar_lea.sflag [#allocation3], %s307_s15 }
  0x19   : > { %s999_s13 = sshra.s32 %s318_s25, 4  ;;  %s1006_s21 = scalar_lea.hbm %s1347_s0, 16  ;;  %s1000_s13 = int_to_ptr.hbm [resolvable:$true] %s999_s13 }
  0x1a   : > { %s1001_s12 = scalar_lea.hbm %s1000_s13, 8  ;;  %p1003_p2 = pneg %p1191_p13 }
  0x1b   : > { %p1002_p0 = scmp.ne.s32.totalorder %s1000_s13, %s1001_s12  ;;  %p1007_p6 = scmp.lt.s32.totalorder %s1000_s13, %s1347_s0 }
  0x1c   : > { %p1008_p7 = scmp.lt.s32.totalorder %s1006_s21, %s1001_s12 }
  0x1d   : > { %p1004_p4 = pnand %p1003_p2, %p1002_p0 }
  0x1e   : > { %p1009_p8 = por %p1008_p7, %p1007_p6 }
  0x1f   : > { %p1005_p5 = pneg %p1004_p4 }
  0x21   : > { %p1010_p9 = pnand %p1009_p8, %p1005_p5 }
  0x23   : > { %1013 = shalt.err (!%p1010_p9)
}
  0x24   : > { %892 = dma.hbm_to_vmem [thread:$0]  (!%p1191_p13), %s318_s25, 128, %s320_s27, %s308_s28  }
  0x25   : > { %328 = sbr.rel (%p1154_p3) target bundleno = 610 (0x262), region = 56  ;;  %s330_s15 = sand.u32 (!%p1154_p3), 1, %s1059_s10  }
  0x26   : > { %s1208_s24 = sshll.u32 (!%p1154_p3), %s330_s15, 3  ;;  %s331_s26 = scalar_lea.sflag (!%p1154_p3), [#allocation3], %s330_s15 }
  0x27   : > { %s334_s14 = scalar_lea.vmem (!%p1154_p3), [#allocation2], %s1208_s24 }
  0x2a   : > { %1046 = dma.done.wait (%p1181_p10), %s331_s26, 128  }
  0x2b   : > { %1048 = vsyncadd (%p1181_p10), %s331_s26, 4294967168 }
  0x2c   : > { %1050 = dma.done.wait (%p44_p1), [#allocation5], 16384  }
  0x2d   : > { %1052 = vsyncadd (%p44_p1), [#allocation5], 4294950912  ;;  %v446_v0 = vld [vmem:[#allocation4 + $0x1f0] sm:$0xff]  ;;  %v447_v2 = vld [vmem:[#allocation4 + $0x1f8] sm:$0xff]  ;;  %p379_p1 = scmp.lt.s32.totalorder %s1149_s16, 1  ;;  %vm772_vm0 = vcmask 64512  }
  0x2e   : > { %v442_v1 = vld [vmem:[#allocation4 + $0x1d0] sm:$0xff]  ;;  %498 = vmatpush.msra.mxu2 %v446_v0  ;;  %518 = vmatpush.msra.mxu3 %v447_v2  ;;  %v443_v3 = vld [vmem:[#allocation4 + $0x1d8] sm:$0xff]  ;;  %v444_v6 = vld [vmem:[#allocation4 + $0x1e0] sm:$0xff] }
  0x2f   : > { %v438_v4 = vld [vmem:[#allocation4 + $0x1b0] sm:$0xff]  ;;  %v439_v5 = vld [vmem:[#allocation4 + $0x1b8] sm:$0xff]  ;;  %v440_v7 = vld [vmem:[#allocation4 + $0x1c0] sm:$0xff]  ;;  %458 = vmatpush.msra.mxu0 %v444_v6  ;;  %s1365_s16 = smov (!%p379_p1, %s1149_s16), 1 }
  0x30   : > { %499 = vmatpush.msra.mxu2 %v442_v1  ;;  %519 = vmatpush.msra.mxu3 %v443_v3  ;;  %v445_v8 = vld [vmem:[#allocation4 + $0x1e8] sm:$0xff]  ;;  %v434_v9 = vld [vmem:[#allocation4 + $0x190] sm:$0xff]  ;;  %v435_v10 = vld [vmem:[#allocation4 + $0x198] sm:$0xff]  ;;  %s869_s13 = sshll.u32 %s1365_s16, 3 }
  0x31   : > { %478 = vmatpush.msra.mxu1 %v445_v8  ;;  %v436_v11 = vld [vmem:[#allocation4 + $0x1a0] sm:$0xff]  ;;  %v441_v12 = vld [vmem:[#allocation4 + $0x1c8] sm:$0xff]  ;;  %v430_v13 = vld [vmem:[#allocation4 + $0x170] sm:$0xff]  ;;  %459 = vmatpush.msra.mxu0 %v440_v7  ;;  %s382_s23 = scalar_lea.vmem %s1356_s9, %s869_s13 }
  0x32   : > { %500 = vmatpush.msra.mxu2 %v438_v4  ;;  %520 = vmatpush.msra.mxu3 %v439_v5  ;;  %v431_v14 = vld [vmem:[#allocation4 + $0x178] sm:$0xff]  ;;  %v437_v15 = vld [vmem:[#allocation4 + $0x1a8] sm:$0xff]  ;;  %v432_v16 = vld [vmem:[#allocation4 + $0x180] sm:$0xff] }
  0x33   : > { %479 = vmatpush.msra.mxu1 %v441_v12  ;;  %v433_v17 = vld [vmem:[#allocation4 + $0x188] sm:$0xff]  ;;  %v426_v18 = vld [vmem:[#allocation4 + $0x150] sm:$0xff]  ;;  %460 = vmatpush.msra.mxu0 %v436_v11  ;;  %v427_v19 = vld [vmem:[#allocation4 + $0x158] sm:$0xff] }
  0x34   : > { %501 = vmatpush.msra.mxu2 %v434_v9  ;;  %521 = vmatpush.msra.mxu3 %v435_v10  ;;  %v428_v20 = vld [vmem:[#allocation4 + $0x160] sm:$0xff]  ;;  %v429_v21 = vld [vmem:[#allocation4 + $0x168] sm:$0xff]  ;;  %v422_v22 = vld [vmem:[#allocation4 + $0x130] sm:$0xff] }
  0x35   : > { %480 = vmatpush.msra.mxu1 %v437_v15  ;;  %461 = vmatpush.msra.mxu0 %v432_v16  ;;  %v423_v23 = vld [vmem:[#allocation4 + $0x138] sm:$0xff]  ;;  %v424_v24 = vld [vmem:[#allocation4 + $0x140] sm:$0xff]  ;;  %v425_v25 = vld [vmem:[#allocation4 + $0x148] sm:$0xff] }
  0x36   : > { %502 = vmatpush.msra.mxu2 %v430_v13  ;;  %522 = vmatpush.msra.mxu3 %v431_v14  ;;  %v418_v26 = vld [vmem:[#allocation4 + $0x110] sm:$0xff]  ;;  %v419_v27 = vld [vmem:[#allocation4 + $0x118] sm:$0xff]  ;;  %v420_v28 = vld [vmem:[#allocation4 + $0x120] sm:$0xff] }
  0x37   : > { %481 = vmatpush.msra.mxu1 %v433_v17  ;;  %462 = vmatpush.msra.mxu0 %v428_v20  ;;  %v421_v29 = vld [vmem:[#allocation4 + $0x128] sm:$0xff]  ;;  %v414_v30 = vld [vmem:[#allocation4 + $0xf0] sm:$0xff]  ;;  %v415_v31 = vld [vmem:[#allocation4 + $0xf8] sm:$0xff] }
  0x38   : > { %503 = vmatpush.msra.mxu2 %v426_v18  ;;  %523 = vmatpush.msra.mxu3 %v427_v19  ;;  %v416_v32 = vld [vmem:[#allocation4 + $0x100] sm:$0xff]  ;;  %v417_v33 = vld [vmem:[#allocation4 + $0x108] sm:$0xff]  ;;  %v410_v34 = vld [vmem:[#allocation4 + $0xd0] sm:$0xff] }
  0x39   : > { %482 = vmatpush.msra.mxu1 %v429_v21  ;;  %463 = vmatpush.msra.mxu0 %v424_v24  ;;  %v411_v35 = vld [vmem:[#allocation4 + $0xd8] sm:$0xff]  ;;  %v412_v36 = vld [vmem:[#allocation4 + $0xe0] sm:$0xff]  ;;  %v413_v37 = vld [vmem:[#allocation4 + $0xe8] sm:$0xff] }
  0x3a   : > { %504 = vmatpush.msra.mxu2 %v422_v22  ;;  %524 = vmatpush.msra.mxu3 %v423_v23  ;;  %v406_v38 = vld [vmem:[#allocation4 + $0xb0] sm:$0xff]  ;;  %v407_v39 = vld [vmem:[#allocation4 + $0xb8] sm:$0xff]  ;;  %v408_v40 = vld [vmem:[#allocation4 + $0xc0] sm:$0xff] }
  0x3b   : > { %483 = vmatpush.msra.mxu1 %v425_v25  ;;  %464 = vmatpush.msra.mxu0 %v420_v28  ;;  %v409_v41 = vld [vmem:[#allocation4 + $0xc8] sm:$0xff]  ;;  %v402_v42 = vld [vmem:[#allocation4 + $0x90] sm:$0xff]  ;;  %v403_v43 = vld [vmem:[#allocation4 + $0x98] sm:$0xff] }
  0x3c   : > { %505 = vmatpush.msra.mxu2 %v418_v26  ;;  %525 = vmatpush.msra.mxu3 %v419_v27  ;;  %v404_v44 = vld [vmem:[#allocation4 + $0xa0] sm:$0xff]  ;;  %v405_v45 = vld [vmem:[#allocation4 + $0xa8] sm:$0xff]  ;;  %v398_v46 = vld [vmem:[#allocation4 + $0x70] sm:$0xff] }
  0x3d   : > { %484 = vmatpush.msra.mxu1 %v421_v29  ;;  %465 = vmatpush.msra.mxu0 %v416_v32  ;;  %v399_v47 = vld [vmem:[#allocation4 + $0x78] sm:$0xff]  ;;  %v400_v48 = vld [vmem:[#allocation4 + $0x80] sm:$0xff]  ;;  %v401_v49 = vld [vmem:[#allocation4 + $0x88] sm:$0xff] }
  0x3e   : > { %506 = vmatpush.msra.mxu2 %v414_v30  ;;  %526 = vmatpush.msra.mxu3 %v415_v31  ;;  %v394_v50 = vld [vmem:[#allocation4 + $0x50] sm:$0xff]  ;;  %v395_v51 = vld [vmem:[#allocation4 + $0x58] sm:$0xff]  ;;  %v396_v52 = vld [vmem:[#allocation4 + $0x60] sm:$0xff] }
  0x3f   : > { %485 = vmatpush.msra.mxu1 %v417_v33  ;;  %466 = vmatpush.msra.mxu0 %v412_v36  ;;  %v397_v53 = vld [vmem:[#allocation4 + $0x68] sm:$0xff]  ;;  %v390_v54 = vld [vmem:[#allocation4 + $0x30] sm:$0xff]  ;;  %v391_v55 = vld [vmem:[#allocation4 + $0x38] sm:$0xff] }
  0x40   : > { %507 = vmatpush.msra.mxu2 %v410_v34  ;;  %527 = vmatpush.msra.mxu3 %v411_v35  ;;  %v392_v56 = vld [vmem:[#allocation4 + $0x40] sm:$0xff]  ;;  %v393_v57 = vld [vmem:[#allocation4 + $0x48] sm:$0xff]  ;;  %v386_v58 = vld [vmem:[#allocation4 + $0x10] sm:$0xff] }
  0x41   : > { %486 = vmatpush.msra.mxu1 %v413_v37  ;;  %467 = vmatpush.msra.mxu0 %v408_v40  ;;  %v387_v59 = vld [vmem:[#allocation4 + $0x18] sm:$0xff]  ;;  %v388_v61 = vld [vmem:[#allocation4 + $0x20] sm:$0xff]  ;;  %v389_v62 = vld [vmem:[#allocation4 + $0x28] sm:$0xff] }
  0x42   : > { %508 = vmatpush.msra.mxu2 %v406_v38  ;;  %528 = vmatpush.msra.mxu3 %v407_v39  ;;  %v383_v60 = vld [vmem:[%s334_s14] sm:$0xff]  ;;  %v384_v1 = vld [vmem:[#allocation4] sm:$0xff]  ;;  %v385_v2 = vld [vmem:[#allocation4 + $0x8] sm:$0xff] }
  0x43   : > { %487 = vmatpush.msra.mxu1 %v409_v41  ;;  %468 = vmatpush.msra.mxu0 %v404_v44  ;;  %v589_v63 = vld [vmem:[#allocation6 + $0x178] sm:$0xff]  ;;  %v588_v4 = vld [vmem:[#allocation6 + $0x170] sm:$0xff]  ;;  %v587_v8 = vld [vmem:[#allocation6 + $0x168] sm:$0xff] }
  0x44   : > { %509 = vmatpush.msra.mxu2 %v402_v42  ;;  %529 = vmatpush.msra.mxu3 %v403_v43  ;;  %v605_v0 = vld [vmem:[#allocation6 + $0x1f8] sm:$0xff]  ;;  %v604_v6 = vld [vmem:[#allocation6 + $0x1f0] sm:$0xff]  ;;  %v555_v9 = vld [vmem:[#allocation6 + $0x68] sm:$0xff] }
  0x45   : > { %488 = vmatpush.msra.mxu1 %v405_v45  ;;  %469 = vmatpush.msra.mxu0 %v400_v48  ;;  %v557_v3 = vld [vmem:[#allocation6 + $0x78] sm:$0xff]  ;;  %v556_v7 = vld [vmem:[#allocation6 + $0x70] sm:$0xff]  ;;  %v603_v11 = vld [vmem:[#allocation6 + $0x1e8] sm:$0xff] }
  0x46   : > { %510 = vmatpush.msra.mxu2 %v398_v46  ;;  %530 = vmatpush.msra.mxu3 %v399_v47  ;;  %v573_v5 = vld [vmem:[#allocation6 + $0xf8] sm:$0xff]  ;;  %v572_v10 = vld [vmem:[#allocation6 + $0xf0] sm:$0xff]  ;;  %v586_v12 = vld [vmem:[#allocation6 + $0x160] sm:$0xff] }
  0x47   : > { %489 = vmatpush.msra.mxu1 %v401_v49  ;;  %470 = vmatpush.msra.mxu0 %v396_v52  ;;  %v571_v13 = vld [vmem:[#allocation6 + $0xe8] sm:$0xff]  ;;  %v602_v14 = vld [vmem:[#allocation6 + $0x1e0] sm:$0xff]  ;;  %v585_v16 = vld [vmem:[#allocation6 + $0x158] sm:$0xff] }
  0x48   : > { %511 = vmatpush.msra.mxu2 %v394_v50  ;;  %531 = vmatpush.msra.mxu3 %v395_v51  ;;  %v554_v15 = vld [vmem:[#allocation6 + $0x60] sm:$0xff]  ;;  %v601_v18 = vld [vmem:[#allocation6 + $0x1d8] sm:$0xff]  ;;  %v584_v20 = vld [vmem:[#allocation6 + $0x150] sm:$0xff] }
  0x49   : > { %490 = vmatpush.msra.mxu1 %v397_v53  ;;  %471 = vmatpush.msra.mxu0 %v392_v56  ;;  %v570_v17 = vld [vmem:[#allocation6 + $0xe0] sm:$0xff]  ;;  %v553_v19 = vld [vmem:[#allocation6 + $0x58] sm:$0xff]  ;;  %v600_v22 = vld [vmem:[#allocation6 + $0x1d0] sm:$0xff] }
  0x4a   : > { %512 = vmatpush.msra.mxu2 %v390_v54  ;;  %532 = vmatpush.msra.mxu3 %v391_v55  ;;  %v569_v21 = vld [vmem:[#allocation6 + $0xd8] sm:$0xff]  ;;  %v552_v23 = vld [vmem:[#allocation6 + $0x50] sm:$0xff]  ;;  %v583_v24 = vld [vmem:[#allocation6 + $0x148] sm:$0xff] }
  0x4b   : > { %491 = vmatpush.msra.mxu1 %v393_v57  ;;  %472 = vmatpush.msra.mxu0 %v388_v61  ;;  %v568_v25 = vld [vmem:[#allocation6 + $0xd0] sm:$0xff]  ;;  %v599_v26 = vld [vmem:[#allocation6 + $0x1c8] sm:$0xff]  ;;  %v582_v28 = vld [vmem:[#allocation6 + $0x140] sm:$0xff] }
  0x4c   : > { %513 = vmatpush.msra.mxu2 %v386_v58  ;;  %533 = vmatpush.msra.mxu3 %v387_v59  ;;  %v551_v27 = vld [vmem:[#allocation6 + $0x48] sm:$0xff]  ;;  %v598_v30 = vld [vmem:[#allocation6 + $0x1c0] sm:$0xff]  ;;  %v581_v32 = vld [vmem:[#allocation6 + $0x138] sm:$0xff] }
  0x4d   : > { %514 = vmatmul.f32.vlgmr.msra.gmra.mxu2 %v383_v60  ;;  %534 = vmatmul.f32.vlgmr.msra.gmra.mxu3 %v383_v60  ;;  %v567_v29 = vld [vmem:[#allocation6 + $0xc8] sm:$0xff]  ;;  %v550_v31 = vld [vmem:[#allocation6 + $0x40] sm:$0xff]  ;;  %v597_v34 = vld [vmem:[#allocation6 + $0x1b8] sm:$0xff] }
  0x4e   : > { %492 = vmatpush.msra.mxu1 %v389_v62  ;;  %650 = vmatpush.msrb.mxu2 %v589_v63  ;;  %v566_v33 = vld [vmem:[#allocation6 + $0xc0] sm:$0xff]  ;;  %v549_v35 = vld [vmem:[#allocation6 + $0x38] sm:$0xff]  ;;  %v580_v36 = vld [vmem:[#allocation6 + $0x130] sm:$0xff] }
  0x4f   : > { %670 = vmatpush.msrb.mxu3 %v605_v0  ;;  %473 = vmatpush.msra.mxu0 %v384_v1  ;;  %v565_v37 = vld [vmem:[#allocation6 + $0xb8] sm:$0xff]  ;;  %v596_v38 = vld [vmem:[#allocation6 + $0x1b0] sm:$0xff]  ;;  %v579_v40 = vld [vmem:[#allocation6 + $0x128] sm:$0xff] }
  0x50   : > { %493 = vmatpush.msra.mxu1 %v385_v2  ;;  %474 = vmatmul.f32.vlgmr.msra.gmra.mxu0 %v383_v60  ;;  %v548_v39 = vld [vmem:[#allocation6 + $0x30] sm:$0xff]  ;;  %v595_v42 = vld [vmem:[#allocation6 + $0x1a8] sm:$0xff]  ;;  %v578_v44 = vld [vmem:[#allocation6 + $0x120] sm:$0xff] }
  0x51   : > { %494 = vmatmul.f32.vlgmr.msra.gmra.mxu1 %v383_v60  ;;  %610 = vmatpush.msrb.mxu0 %v557_v3  ;;  %v564_v41 = vld [vmem:[#allocation6 + $0xb0] sm:$0xff]  ;;  %v547_v43 = vld [vmem:[#allocation6 + $0x28] sm:$0xff]  ;;  %v594_v46 = vld [vmem:[#allocation6 + $0x1a0] sm:$0xff] }
  0x52   : > { %651 = vmatpush.msrb.mxu2 %v588_v4  ;;  %630 = vmatpush.msrb.mxu1 %v573_v5  ;;  %v563_v45 = vld [vmem:[#allocation6 + $0xa8] sm:$0xff]  ;;  %v546_v47 = vld [vmem:[#allocation6 + $0x20] sm:$0xff]  ;;  %v577_v48 = vld [vmem:[#allocation6 + $0x118] sm:$0xff] }
  0x53   : > { %671 = vmatpush.msrb.mxu3 %v604_v6  ;;  %611 = vmatpush.msrb.mxu0 %v556_v7  ;;  %v545_v49 = vld [vmem:[#allocation6 + $0x18] sm:$0xff]  ;;  %v562_v50 = vld [vmem:[#allocation6 + $0xa0] sm:$0xff]  ;;  %v576_v51 = vld [vmem:[#allocation6 + $0x110] sm:$0xff] }
  0x54   : > { %652 = vmatpush.msrb.mxu2 %v587_v8  ;;  %631 = vmatpush.msrb.mxu1 %v572_v10  ;;  %v593_v52 = vld [vmem:[#allocation6 + $0x198] sm:$0xff]  ;;  %v544_v53 = vld [vmem:[#allocation6 + $0x10] sm:$0xff]  ;;  %v575_v55 = vld [vmem:[#allocation6 + $0x108] sm:$0xff] }
  0x55   : > { %672 = vmatpush.msrb.mxu3 %v603_v11  ;;  %612 = vmatpush.msrb.mxu0 %v555_v9  ;;  %v561_v54 = vld [vmem:[#allocation6 + $0x98] sm:$0xff]  ;;  %v592_v56 = vld [vmem:[#allocation6 + $0x190] sm:$0xff]  ;;  %v543_v57 = vld [vmem:[#allocation6 + $0x8] sm:$0xff] }
  0x56   : > { %653 = vmatpush.msrb.mxu2 %v586_v12  ;;  %632 = vmatpush.msrb.mxu1 %v571_v13  ;;  %v560_v58 = vld [vmem:[#allocation6 + $0x90] sm:$0xff]  ;;  %v574_v59 = vld [vmem:[#allocation6 + $0x100] sm:$0xff]  ;;  %v591_v60 = vld [vmem:[#allocation6 + $0x188] sm:$0xff] }
  0x57   : > { %673 = vmatpush.msrb.mxu3 %v602_v14  ;;  %613 = vmatpush.msrb.mxu0 %v554_v15  ;;  %v542_v61 = vld [vmem:[#allocation6] sm:$0xff]  ;;  %v559_v62 = vld [vmem:[#allocation6 + $0x88] sm:$0xff]  ;;  %v704_v3 = vld [vmem:[%s1352_s5 + $0x68] sm:$0xff] }
  0x58   : > { %654 = vmatpush.msrb.mxu2 %v585_v16  ;;  %633 = vmatpush.msrb.mxu1 %v570_v17  ;;  %v590_v63 = vld [vmem:[#allocation6 + $0x180] sm:$0xff]  ;;  %v706_v1 = vld [vmem:[%s1352_s5 + $0x78] sm:$0xff]  ;;  %v703_v4 = vld [vmem:[%s1352_s5 + $0x60] sm:$0xff] }
  0x59   : > { %674 = vmatpush.msrb.mxu3 %v601_v18  ;;  %614 = vmatpush.msrb.mxu0 %v553_v19  ;;  %v558_v0 = vld [vmem:[#allocation6 + $0x80] sm:$0xff]  ;;  %v702_v5 = vld [vmem:[%s1352_s5 + $0x58] sm:$0xff]  ;;  %v700_v7 = vld [vmem:[%s1352_s5 + $0x48] sm:$0xff] }
  0x5a   : > { %655 = vmatpush.msrb.mxu2 %v584_v20  ;;  %634 = vmatpush.msrb.mxu1 %v569_v21  ;;  %v705_v2 = vld [vmem:[%s1352_s5 + $0x70] sm:$0xff]  ;;  %v699_v8 = vld [vmem:[%s1352_s5 + $0x40] sm:$0xff]  ;;  %v698_v9 = vld [vmem:[%s1352_s5 + $0x38] sm:$0xff] }
  0x5b   : > { %675 = vmatpush.msrb.mxu3 %v600_v22  ;;  %615 = vmatpush.msrb.mxu0 %v552_v23  ;;  %v701_v6 = vld [vmem:[%s1352_s5 + $0x50] sm:$0xff]  ;;  %v448_v11 = vld [vmem:[%s1349_s2] sm:$0xf] }
  0x5c   : > { %656 = vmatpush.msrb.mxu2 %v583_v24  ;;  %635 = vmatpush.msrb.mxu1 %v568_v25  ;;  %v697_v10 = vld [vmem:[%s1352_s5 + $0x30] sm:$0xff]  ;;  %v450_v12 = vperm.slane %v448_v11, 0  ;;  %v451_v13 = vperm.slane %v448_v11, 1  ;;  %v452_v14 = vperm.slane %v448_v11, 2  ;;  %v453_v15 = vperm.slane %v448_v11, 3 }
  0x5d   : > { %676 = vmatpush.msrb.mxu3 %v599_v26  ;;  %616 = vmatpush.msrb.mxu0 %v551_v27 }
  0x5e   : > { %657 = vmatpush.msrb.mxu2 %v582_v28  ;;  %636 = vmatpush.msrb.mxu1 %v567_v29  ;;  %v696_v28 = vld [vmem:[%s1352_s5 + $0x28] sm:$0xff]  ;;  %v695_v29 = vld [vmem:[%s1352_s5 + $0x20] sm:$0xff] }
  0x5f   : > { %677 = vmatpush.msrb.mxu3 %v598_v30  ;;  %617 = vmatpush.msrb.mxu0 %v550_v31  ;;  %v694_v30 = vld [vmem:[%s1352_s5 + $0x18] sm:$0xff]  ;;  %v693_v31 = vld [vmem:[%s1352_s5 + $0x10] sm:$0xff] }
  0x60   : > { %658 = vmatpush.msrb.mxu2 %v581_v32  ;;  %637 = vmatpush.msrb.mxu1 %v566_v33  ;;  %v692_v32 = vld [vmem:[%s1352_s5 + $0x8] sm:$0xff]  ;;  %v691_v33 = vld [vmem:[%s1352_s5] sm:$0xff] }
  0x61   : > { %678 = vmatpush.msrb.mxu3 %v597_v34  ;;  %618 = vmatpush.msrb.mxu0 %v549_v35  ;;  %v747_v34 = vld [vmem:[%s1354_s7 + $0x78] sm:$0xff]  ;;  %v746_v35 = vld [vmem:[%s1354_s7 + $0x70] sm:$0xff] }
  0x62   : > { %659 = vmatpush.msrb.mxu2 %v580_v36  ;;  %638 = vmatpush.msrb.mxu1 %v565_v37  ;;  %v745_v36 = vld [vmem:[%s1354_s7 + $0x68] sm:$0xff]  ;;  %v744_v37 = vld [vmem:[%s1354_s7 + $0x60] sm:$0xff] }
  0x63   : > { %679 = vmatpush.msrb.mxu3 %v596_v38  ;;  %619 = vmatpush.msrb.mxu0 %v548_v39  ;;  %v743_v38 = vld [vmem:[%s1354_s7 + $0x58] sm:$0xff]  ;;  %v742_v39 = vld [vmem:[%s1354_s7 + $0x50] sm:$0xff] }
  0x64   : > { %660 = vmatpush.msrb.mxu2 %v579_v40  ;;  %639 = vmatpush.msrb.mxu1 %v564_v41  ;;  %v741_v40 = vld [vmem:[%s1354_s7 + $0x48] sm:$0xff]  ;;  %v740_v41 = vld [vmem:[%s1354_s7 + $0x40] sm:$0xff] }
  0x65   : > { %680 = vmatpush.msrb.mxu3 %v595_v42  ;;  %620 = vmatpush.msrb.mxu0 %v547_v43  ;;  %v936_v42 = vld [vmem:[%s1351_s4] ss:$0 sm:$0xff]  ;;  %v739_v43 = vld [vmem:[%s1354_s7 + $0x38] sm:$0xff] }
  0x66   : > { %661 = vmatpush.msrb.mxu2 %v578_v44  ;;  %640 = vmatpush.msrb.mxu1 %v563_v45  ;;  %v738_v44 = vld [vmem:[%s1354_s7 + $0x30] sm:$0xff] }
  0x67   : > { %681 = vmatpush.msrb.mxu3 %v594_v46  ;;  %621 = vmatpush.msrb.mxu0 %v546_v47  ;;  %v737_v47 = vld [vmem:[%s1354_s7 + $0x28] sm:$0xff] }
  0x68   : > { %662 = vmatpush.msrb.mxu2 %v577_v48  ;;  %641 = vmatpush.msrb.mxu1 %v562_v50 }
  0x69   : > { %622 = vmatpush.msrb.mxu0 %v545_v49  ;;  %682 = vmatpush.msrb.mxu3 %v593_v52  ;;  %v736_v49 = vld [vmem:[%s1354_s7 + $0x20] sm:$0xff] }
  0x6a   : > { %663 = vmatpush.msrb.mxu2 %v576_v51  ;;  %642 = vmatpush.msrb.mxu1 %v561_v54  ;;  %v735_v51 = vld [vmem:[%s1354_s7 + $0x18] sm:$0xff] }
  0x6b   : > { %623 = vmatpush.msrb.mxu0 %v544_v53  ;;  %683 = vmatpush.msrb.mxu3 %v592_v56 }
  0x6c   : > { %664 = vmatpush.msrb.mxu2 %v575_v55  ;;  %643 = vmatpush.msrb.mxu1 %v560_v58  ;;  %v733_v58 = vld [vmem:[%s1354_s7 + $0x8] sm:$0xff] }
  0x6d   : > { %624 = vmatpush.msrb.mxu0 %v543_v57  ;;  %684 = vmatpush.msrb.mxu3 %v591_v60  ;;  %v734_v57 = vld [vmem:[%s1354_s7 + $0x10] sm:$0xff]  ;;  %v937_v60 = vld [vmem:[%s1353_s6] ss:$0 sm:$0xff] }
  0x6e   : > { %665 = vmatpush.msrb.mxu2 %v574_v59  ;;  %644 = vmatpush.msrb.mxu1 %v559_v62  ;;  %v732_v59 = vld [vmem:[%s1354_s7] sm:$0xff] }
  0x6f   : > { %625 = vmatpush.msrb.mxu0 %v542_v61  ;;  %685 = vmatpush.msrb.mxu3 %v590_v63 }
  0x70   : > { %645 = vmatpush.msrb.mxu1 %v558_v0  ;;  %v938_v0 = vld [vmem:[%s1355_s8] ss:$0 sm:$0xff] }
  0x71   : > { %711 = vmatpush.msra.mxu0 %v706_v1 }
  0x72   : > { %752 = vmatpush.msra.mxu1 %v747_v34 }
  0x73   : > { %712 = vmatpush.msra.mxu0 %v705_v2 }
  0x74   : > { %753 = vmatpush.msra.mxu1 %v746_v35 }
  0x75   : > { %713 = vmatpush.msra.mxu0 %v704_v3 }
  0x76   : > { %754 = vmatpush.msra.mxu1 %v745_v36 }
  0x77   : > { %714 = vmatpush.msra.mxu0 %v703_v4 }
  0x78   : > { %755 = vmatpush.msra.mxu1 %v744_v37 }
  0x79   : > { %715 = vmatpush.msra.mxu0 %v702_v5 }
  0x7a   : > { %756 = vmatpush.msra.mxu1 %v743_v38 }
  0x7b   : > { %716 = vmatpush.msra.mxu0 %v701_v6 }
  0x7c   : > { %757 = vmatpush.msra.mxu1 %v742_v39 }
  0x7d   : > { %717 = vmatpush.msra.mxu0 %v700_v7 }
  0x7e   : > { %758 = vmatpush.msra.mxu1 %v741_v40 }
  0x7f   : > { %718 = vmatpush.msra.mxu0 %v699_v8 }
  0x80   : > { %759 = vmatpush.msra.mxu1 %v740_v41 }
  0x81   : > { %719 = vmatpush.msra.mxu0 %v698_v9 }
  0x82   : > { %760 = vmatpush.msra.mxu1 %v739_v43 }
  0x83   : > { %720 = vmatpush.msra.mxu0 %v697_v10 }
  0x84   : > { %761 = vmatpush.msra.mxu1 %v738_v44 }
  0x85   : > { %721 = vmatpush.msra.mxu0 %v696_v28 }
  0x86   : > { %762 = vmatpush.msra.mxu1 %v737_v47 }
  0x87   : > { %722 = vmatpush.msra.mxu0 %v695_v29 }
  0x88   : > { %763 = vmatpush.msra.mxu1 %v736_v49 }
  0x89   : > { %723 = vmatpush.msra.mxu0 %v694_v30 }
  0x8a   : > { %764 = vmatpush.msra.mxu1 %v735_v51 }
  0x8b   : > { %724 = vmatpush.msra.mxu0 %v693_v31 }
  0x8c   : > { %765 = vmatpush.msra.mxu1 %v734_v57 }
  0x8d   : > { %725 = vmatpush.msra.mxu0 %v692_v32 }
  0x8e   : > { %766 = vmatpush.msra.mxu1 %v733_v58 }
  0x8f   : > { %726 = vmatpush.msra.mxu0 %v691_v33 }
  0x90   : > { %767 = vmatpush.msra.mxu1 %v732_v59 }
  0xcd   : > { %v475_v16 = vpop.f32.mrf.mxu0 }
  0xce   : > { %v495_v17 = vpop.f32.mrf.mxu1  ;;  %v476_v18 = vadd.f32 %v475_v16, %v450_v12 }
  0xcf   : > { %v496_v19 = vadd.f32 %v495_v17, %v451_v13 }
  0xd0   : > { %v515_v20 = vpop.f32.mrf.mxu2  ;;  %v535_v21 = vpop.f32.mrf.mxu3  ;;  %v538_v23 = vmax.f32 %v476_v18, 0.0 }
  0xd1   : > { %v516_v22 = vadd.f32 %v515_v20, %v452_v14  ;;  %v536_v24 = vadd.f32 %v535_v21, %v453_v15  ;;  %v539_v25 = vmax.f32 %v496_v19, 0.0 }
  0xd2   : > { %626 = vmatmul.f32.vlgmr.msrb.gmra.mxu0 %v538_v23 }
  0xd3   : > { %v540_v26 = vmax.f32 %v516_v22, 0.0  ;;  %v541_v27 = vmax.f32 %v536_v24, 0.0  ;;  %646 = vmatmul.f32.vlgmr.msrb.gmra.mxu1 %v539_v25 }
  0xd5   : > { %666 = vmatmul.f32.vlgmr.msrb.gmra.mxu2 %v540_v26  ;;  %686 = vmatmul.f32.vlgmr.msrb.gmra.mxu3 %v541_v27 }
 0x14f   : > { %v627_v45 = vpop.f32.mrf.mxu0 }
 0x150   : > { %v628_v46 = vadd.f32 %v936_v42, %v627_v45  ;;  %v647_v48 = vpop.f32.mrf.mxu1 }
 0x152   : > { %v648_v50 = vadd.f32 %v647_v48, %v628_v46 }
 0x158   : > { %v667_v52 = vpop.f32.mrf.mxu2  ;;  %v687_v53 = vpop.f32.mrf.mxu3 }
 0x159   : > { %v668_v54 = vadd.f32 %v667_v52, %v648_v50 }
 0x15b   : > { %v688_v55 = vadd.f32 %v687_v53, %v668_v54 }
 0x15d   : > { %v690_v56 = vmax.f32 %v688_v55, 0.0 }
 0x15f   : > { %727 = vmatmul.f32.vlgmr.msra.gmra.mxu0 %v690_v56 }
 0x1dc   : > { %v728_v61 = vpop.f32.mrf.mxu0 }
 0x1dd   : > { %v729_v62 = vadd.f32 %v937_v60, %v728_v61 }
 0x1df   : > { %v731_v63 = vmax.f32 %v729_v62, 0.0 }
 0x1e1   : > { %768 = vmatmul.f32.vlgmr.msra.gmra.mxu1 %v731_v63 }
 0x25e   : > { %v769_v1 = vpop.f32.mrf.mxu1 }
 0x25f   : > { %v770_v2 = vadd.f32 %v938_v0, %v769_v1 }
 0x261   : > { %773 = vst.msk [vmem:[%s382_s23] sm:$0xff] %vm772_vm0, %v770_v2 }
 0x262 PF: > { %p20_p3 = scmp.ge.s32.totalorder %s1166_s29, 4   ;;  %s1360_s30 = smov %s1059_s10 }
 0x263   : > { %s1361_s10 = smov %s1063_s11  ;;  %s1362_s11 = smov %s1177_s18 }
 0x264   : > { %s1363_s12 = smov %s1166_s29  ;;  %22 = sbr.rel (!%p20_p3) target bundleno = 4 (0x4), region = 104 }
 0x269   :  { %793 = vsyncpa [#allocation3], 1 }
 0x26a   :  { %795 = vsyncpa [#allocation3 + $0x1], 1 }
 0x26b   :  { %796 = vsyncpa [#allocation5], 1 }

</bundles_post_ra>
